<compile_context>
chip_gen: v5e
topology: v5e:2x2
jax: 0.10.0
libtpu: 0.0.40
codegen_flags: <defaults>
</compile_context>

<pallas_src>
import functools

import jax
import jax.numpy as jnp
from jax.experimental import pallas as pl
from jax.experimental.pallas import tpu as pltpu


def vanet_kernel(x1_ref, w1_ref, head_ref, q_ref, *, hidden_dim, n_actions):
    # x1:   (tb, n_states+1)            -- trailing ones column (fc1 bias folded in)
    # w1:   (n_states+1, hidden)        -- [W1 ; b1]
    # head: (hidden+1, n_actions+1)     -- [[Wa | Wv] ; [ba | bv]]
    # q:    (tb, n_actions)

    # fc1 (+bias via folded ones column) + ReLU
    h = jnp.dot(x1_ref[...], w1_ref[...], preferred_element_type=jnp.float32)
    h = jnp.maximum(h, 0.0)

    # fused advantage+value head: single MXU push, bias row added on the VPU.
    # hidden_dim is a multiple of 8 -> the sublane split below is layout-clean.
    head_w = head_ref[0:hidden_dim, :]
    head_b = head_ref[hidden_dim:hidden_dim + 1, :]
    av = jnp.dot(h, head_w, preferred_element_type=jnp.float32) + head_b

    a = av[:, :n_actions]
    v = av[:, n_actions:n_actions + 1]

    # dueling combine: q = v + a - mean_a   (mean as sum * 1/n, n static)
    a_mean = jnp.sum(a, axis=1, keepdims=True) * (1.0 / n_actions)
    q_ref[...] = (v + a - a_mean).astype(q_ref.dtype)


def vanet_forward(x, params, *, batch_tile=256):
    """x: (batch, n_states) f32; params = (w1, b1, wa, ba, wv, bv)."""
    w1, b1, wa, ba, wv, bv = params
    batch = x.shape[0]
    n_states = w1.shape[0]
    hidden_dim = w1.shape[1]
    n_actions = wa.shape[1]

    # --- operand packing (7 arrays -> 3 VMEM slabs) -------------------------
    # fc1: fold bias into the contraction (ones column on x, bias row on W1).
    x1 = jnp.concatenate([x, jnp.ones((batch, 1), x.dtype)], axis=1)
    w1_slab = jnp.concatenate([w1, b1], axis=0)               # (n_states+1, hidden)
    # heads: fuse advantage & value into one weight, append fused bias row.
    head_w = jnp.concatenate([wa, wv], axis=1)                # (hidden, n_actions+1)
    head_b = jnp.concatenate([ba, bv], axis=1)                # (1,      n_actions+1)
    head_slab = jnp.concatenate([head_w, head_b], axis=0)     # (hidden+1, n_actions+1)

    # Batch tiling: either the whole (small) batch in one step, or 256-row
    # tiles (multiple of 8 sublanes) pipelined / megacore-sharded for large
    # replay batches.  Last dims of every block equal the full array dims, so
    # the (8,128) block constraint is satisfied for any n_states / n_actions.
    tb = batch if batch <= batch_tile else batch_tile
    grid = (pl.cdiv(batch, tb),)

    kernel = functools.partial(
        vanet_kernel, hidden_dim=hidden_dim, n_actions=n_actions)

    return pl.pallas_call(
        kernel,
        out_shape=jax.ShapeDtypeStruct((batch, n_actions), jnp.float32),
        grid=grid,
        in_specs=[
            pl.BlockSpec((tb, n_states + 1), lambda i: (i, 0)),
            pl.BlockSpec((n_states + 1, hidden_dim), lambda i: (0, 0)),
            pl.BlockSpec((hidden_dim + 1, n_actions + 1), lambda i: (0, 0)),
        ],
        out_specs=pl.BlockSpec((tb, n_actions), lambda i: (i, 0)),
        compiler_params=pltpu.CompilerParams(
            dimension_semantics=("parallel",)),
    )(x1, w1_slab, head_slab)


def init_params(key, n_states, hidden_dim, n_actions):
    """Deterministic init mimicking nn.Linear (uniform +/- 1/sqrt(fan_in))."""
    def linear(key, fan_in, fan_out):
        kw, kb = jax.random.split(key)
        bound = 1.0 / jnp.sqrt(jnp.float32(fan_in))
        w = jax.random.uniform(kw, (fan_in, fan_out), jnp.float32, -bound, bound)
        b = jax.random.uniform(kb, (1, fan_out), jnp.float32, -bound, bound)
        return w, b

    k1, k2, k3 = jax.random.split(key, 3)
    w1, b1 = linear(k1, n_states, hidden_dim)
    wa, ba = linear(k2, hidden_dim, n_actions)
    wv, bv = linear(k3, hidden_dim, 1)
    return (w1, b1, wa, ba, wv, bv)


def vanet_reference(x, params):
    """Pure-JAX reference (unpacked params) for correctness check."""
    w1, b1, wa, ba, wv, bv = params
    h = jnp.maximum(x @ w1 + b1, 0.0)
    a = h @ wa + ba
    v = h @ wv + bv
    return v + a - jnp.mean(a, axis=1, keepdims=True)


if __name__ == "__main__":
    # CartPole-like config: n_states=4, n_actions=2, hidden_dim=32, batch=2.
    batch, n_states, hidden_dim, n_actions = 2, 4, 32, 2

    key = jax.random.PRNGKey(0)
    k_params, k_x = jax.random.split(key)
    params = init_params(k_params, n_states, hidden_dim, n_actions)
    x = jax.random.normal(k_x, (batch, n_states), jnp.float32)

    fwd = jax.jit(vanet_forward)   # fuse the slab-packing concats with the call
    q = fwd(x, params)
    q = jax.block_until_ready(q)

    q_ref = vanet_reference(x, params)
    assert q.shape == (batch, n_actions)
    assert jnp.allclose(q, q_ref, atol=1e-5, rtol=1e-5), (q, q_ref)

    print("KERNEL_OK")
</pallas_src>

<mosaic_0001>
module attributes {stable_mosaic.version = 11 : i64} {
  func.func @vanet_kernel(%arg0: i32, %arg1: memref<2x5xf32, #tpu.memory_space<vmem>>, %arg2: memref<5x32xf32, #tpu.memory_space<vmem>>, %arg3: memref<33x3xf32, #tpu.memory_space<vmem>>, %arg4: memref<2x2xf32, #tpu.memory_space<vmem>>) attributes {dimension_semantics = [#tpu.dimension_semantics<parallel>], iteration_bounds = array<i64: 1>, scalar_prefetch = 0 : i64, scratch_operands = 0 : i64, tpu.core_type = #tpu.core_type<tc>, window_params = [{transform_indices = @transform_0, window_bounds = array<i64: 2, 5>}, {pipeline_mode = #tpu.pipeline_mode<synchronous>, transform_indices = @transform_1, window_bounds = array<i64: 5, 32>}, {pipeline_mode = #tpu.pipeline_mode<synchronous>, transform_indices = @transform_2, window_bounds = array<i64: 33, 3>}, {transform_indices = @transform_3, window_bounds = array<i64: 2, 2>}]} {
    %c0 = arith.constant 0 : index
    %c0_0 = arith.constant 0 : index
    %0 = vector.load %arg1[%c0, %c0_0] : memref<2x5xf32, #tpu.memory_space<vmem>>, vector<2x5xf32>
    %c0_1 = arith.constant 0 : index
    %c0_2 = arith.constant 0 : index
    %1 = vector.load %arg2[%c0_1, %c0_2] : memref<5x32xf32, #tpu.memory_space<vmem>>, vector<5x32xf32>
    %cst = arith.constant dense<0.000000e+00> : vector<2x32xf32>
    %2 = tpu.matmul %0, %1, %cst {dimension_numbers = #tpu.dot_dimension_numbers<[1], [0], [0], [1], [0, 0, 1, 1], [], []>} : vector<2x5xf32>, vector<5x32xf32>, vector<2x32xf32> -> vector<2x32xf32>
    %cst_3 = arith.constant 0.000000e+00 : f32
    %3 = vector.broadcast %cst_3 : f32 to vector<2x32xf32>
    %4 = arith.maximumf %2, %3 : vector<2x32xf32>
    %c0_4 = arith.constant 0 : index
    %c0_5 = arith.constant 0 : index
    %5 = vector.load %arg3[%c0_4, %c0_5] : memref<33x3xf32, #tpu.memory_space<vmem>>, vector<32x3xf32>
    %c32 = arith.constant 32 : index
    %c0_6 = arith.constant 0 : index
    %6 = vector.load %arg3[%c32, %c0_6] : memref<33x3xf32, #tpu.memory_space<vmem>>, vector<1x3xf32>
    %cst_7 = arith.constant dense<0.000000e+00> : vector<2x3xf32>
    %7 = tpu.matmul %4, %5, %cst_7 {dimension_numbers = #tpu.dot_dimension_numbers<[1], [0], [0], [1], [0, 0, 1, 1], [], []>} : vector<2x32xf32>, vector<32x3xf32>, vector<2x3xf32> -> vector<2x3xf32>
    %8 = vector.broadcast %6 : vector<1x3xf32> to vector<2x3xf32>
    %9 = arith.addf %7, %8 : vector<2x3xf32>
    %10 = vector.extract_strided_slice %9 {offsets = [0, 0], sizes = [2, 2], strides = [1, 1]} : vector<2x3xf32> to vector<2x2xf32>
    %11 = vector.extract_strided_slice %9 {offsets = [0, 2], sizes = [2, 1], strides = [1, 1]} : vector<2x3xf32> to vector<2x1xf32>
    %cst_8 = arith.constant dense<0.000000e+00> : vector<2xf32>
    %12 = vector.multi_reduction <add>, %10, %cst_8 [1] : vector<2x2xf32> to vector<2xf32>
    %13 = vector.shape_cast %12 : vector<2xf32> to vector<2x1xf32>
    %cst_9 = arith.constant 5.000000e-01 : f32
    %14 = vector.broadcast %cst_9 : f32 to vector<2x1xf32>
    %15 = arith.mulf %13, %14 : vector<2x1xf32>
    %16 = vector.broadcast %11 : vector<2x1xf32> to vector<2x2xf32>
    %17 = arith.addf %16, %10 : vector<2x2xf32>
    %18 = vector.broadcast %15 : vector<2x1xf32> to vector<2x2xf32>
    %19 = arith.subf %17, %18 : vector<2x2xf32>
    %c0_10 = arith.constant 0 : index
    %c0_11 = arith.constant 0 : index
    %20 = vector.load %arg4[%c0_10, %c0_11] : memref<2x2xf32, #tpu.memory_space<vmem>>, vector<2x2xf32>
    tpu.vector_store %arg4[%c0_10, %c0_11], %19 {strides = array<i32>} : memref<2x2xf32, #tpu.memory_space<vmem>>, vector<2x2xf32>,
    return
  }
  func.func @transform_0(%arg0: i32) -> (i32, i32) {
    %c0_i32 = arith.constant 0 : i32
    %c0_i32_0 = arith.constant 0 : i32
    return %arg0, %c0_i32 : i32, i32
  }
  func.func @transform_1(%arg0: i32) -> (i32, i32) {
    %c0_i32 = arith.constant 0 : i32
    %c0_i32_0 = arith.constant 0 : i32
    %c0_i32_1 = arith.constant 0 : i32
    return %c0_i32, %c0_i32_0 : i32, i32
  }
  func.func @transform_2(%arg0: i32) -> (i32, i32) {
    %c0_i32 = arith.constant 0 : i32
    %c0_i32_0 = arith.constant 0 : i32
    %c0_i32_1 = arith.constant 0 : i32
    return %c0_i32, %c0_i32_0 : i32, i32
  }
  func.func @transform_3(%arg0: i32) -> (i32, i32) {
    %c0_i32 = arith.constant 0 : i32
    %c0_i32_0 = arith.constant 0 : i32
    return %arg0, %c0_i32 : i32, i32
  }
}

</mosaic_0001>

<bundles_post_ra>
// kernel: vanet_forward.1
= control target key start
LH: loop header
LB: loop body
LE: loop exit
PB: predicated region body
PF: predicated region fallthrough
CT: control target
= control target key end

     0   :  { %vm21_vm0 = vcmask 1044480   ;;  %vm17_vm1 = vcmask 39936   ;;  %s184_s0 = inlined_call_operand.vmem [shape: f32[2,5], index: 0, kind: input, shape index: {}]   ;;  %s185_s1 = inlined_call_operand.vmem [shape: f32[5,32], index: 1, kind: input, shape index: {}]   ;;  %s186_s2 = inlined_call_operand.vmem [shape: f32[33,3], index: 2, kind: input, shape index: {}]   ;;  %s187_s3 = inlined_call_operand.hbm [shape: f32[2,2], index: 3, kind: output, shape index: {}]  }
   0x1   :  { %v16_v0 = vld [vmem:[%s185_s1] sm:$0x1f]  ;;  %v49_v2 = vld [vmem:[%s186_s2 + $0x18] sm:$0xff]  ;;  %v48_v3 = vld [vmem:[%s186_s2 + $0x10] sm:$0xff] }
   0x2   :  { %v15_v1 = vld [vmem:[%s184_s0] sm:$0x3]  ;;  %105 = vmatpush.msk.msra.mxu0 %vm21_vm0, %v16_v0  ;;  %68 = vmatpush.msra.mxu1 %v49_v2 }
   0x3   :  { %106 = vmatmul.msk.f32.vlgmr.msra.gmra.mxu0 %vm17_vm1, %v15_v1 }
   0x4   :  { %8 = vsyncpa [#allocation3], 0  ;;  %69 = vmatpush.msra.mxu1 %v48_v3  ;;  %v47_v4 = vld [vmem:[%s186_s2 + $0x8] sm:$0xff]  ;;  %v46_v5 = vld [vmem:[%s186_s2] sm:$0xff]  ;;  %vm52_vm2 = vcmask 261120   ;;  %v138_v8 = vmov 2  }
   0x5   :  { %110 = vset.pattern.permute.xlu0 %v138_v8  ;;  %v111_v9 = vld [vmem:[%s186_s2 + $0x20] ss:$0 sm:$0xff]  ;;  %vm76_vm3 = vcmask 9216   ;;  %s139_s24 = smov [#allocation2]   ;;  %s96_s28 = sshll.u32 %s187_s3, 4  ;;  %s97_s28 = int_to_ptr.hbm [resolvable:$true] %s96_s28 }
   0x6   :  { %70 = vmatpush.msra.mxu1 %v47_v4  ;;  %s94_s25 = sshll.u32 %s139_s24, 4  ;;  %s95_s25 = int_to_ptr.vmem [resolvable:$true] %s94_s25 }
   0x8   :  { %71 = vmatpush.msra.mxu1 %v46_v5 }
  0x80   :  { %v42_v6 = vpop.f32.mrf.mxu0 }
  0x81   :  { %v45_v7 = vmax.f32 %v42_v6, 0.0 }
  0x83   :  { %107 = vmatmul.msk.f32.vlgmr.msra.gmra.mxu1 %vm52_vm2, %v45_v7 }
 0x100   :  { %v73_v10 = vpop.f32.mrf.mxu1 }
 0x101   :  { %v74_v11 = vadd.f32 %v111_v9, %v73_v10 }
 0x103   :  { %v77_v12 = vsel %vm76_vm3, %v74_v11, 0.0 }
 0x104   :  { %78 = vadd.xlane.f32.xlu0 %v77_v12 }
 0x118   :  { %83 = vperm.xlu0 %110, %v74_v11  }
 0x177   :  { %v79_v13 = vpop.xlane.xlu0 %78 }
 0x178   :  { %v80_v15 = vmul.f32 0.5, %v79_v13 }
 0x18a   :  { %v84_v14 = vpop.permute.xlu0 %83 }
 0x18b   :  { %v86_v16 = vadd.f32 %v84_v14, %v74_v11 }
 0x18d   :  { %v87_v17 = vsub.f32 %v86_v16, %v80_v15 }
 0x18f   :  { %88 = vst.msk [vmem:[#allocation2] sm:$0x3] %vm76_vm3, %v87_v17 }
 0x190   :  { %99 = dma.vmem_to_hbm [thread:$0]  %s95_s25, 32, %s97_s28, [#allocation3]  }
 0x191   :  { %136 = dma.done.wait [#allocation3], 32  }
 0x192   :  { %137 = vsyncadd [#allocation3], 4294967264 }
 0x193   :  { %104 = vsyncpa [#allocation3], 1 }

</bundles_post_ra>
